<compile_context>
chip_gen: v7x
topology: tpu7x:2x2x1
jax: 0.10.0
libtpu: 0.0.40
codegen_flags: <defaults>
</compile_context>

<pallas_src>
import jax
import jax.numpy as jnp
from jax.experimental import pallas as pl
from jax.experimental.pallas import tpu as pltpu


def _fused_linear_relu_kernel(x_ref, w_ref, b_ref, o_ref):
    # x_ref: (tb, C)  w_ref: (C, N)  b_ref: (1, N) f32  o_ref: (tb, N)
    y = jnp.dot(x_ref[...], w_ref[...], preferred_element_type=jnp.float32)
    y = y + b_ref[...]                      # bias + ReLU kept in f32 (v5e-safe)
    o_ref[...] = jnp.maximum(y, 0.0).astype(o_ref.dtype)


def _round_up(n, m):
    return ((n + m - 1) // m) * m


def hyperspectral_wrapper_forward(x, weights, biases, *,
                                  compute_dtype=None, batch_tile=256):
    """Pallas implementation of HyperspectralWrapper.forward.

    x       : (B, 1, C, P, P) hyperspectral patch, or (B, C) spectrum
    weights : (M, c, h)  per-model Linear weights (x @ W layout), C == M * c
    biases  : (M, h)     per-model biases
    compute_dtype : None (use x.dtype) or e.g. jnp.bfloat16 for v6e/v7x;
                    accumulation / epilogue stay f32 either way.
    returns : (B, M * h) concatenated + flattened features
    """
    M, c, h = weights.shape
    N = M * h

    # --- glue: center-pixel spectrum extraction (pure indexing) -------------
    if x.ndim > 2:
        patch_size = x.shape[-1]
        x = x[:, 0, :, patch_size // 2, patch_size // 2]       # (B, C)
    B, C = x.shape
    assert C == M * c, f"channel mismatch: {C} != {M}*{c}"
    out_dtype = x.dtype

    # --- trace-time weight fusion: block-diagonal (C, N) --------------------
    # True zeros off the diagonal -> ReLU/bias cross-terms cannot leak.
    w_bd = jnp.zeros((C, N), dtype=weights.dtype)
    for m in range(M):
        w_bd = w_bd.at[m * c:(m + 1) * c, m * h:(m + 1) * h].set(weights[m])
    b_cat = biases.reshape(1, N).astype(jnp.float32)            # f32 epilogue

    if compute_dtype is not None:
        x_in = x.astype(compute_dtype)
        w_in = w_bd.astype(compute_dtype)
    else:
        x_in = x
        w_in = w_bd

    # --- batch tiling: multiple-of-8 sublanes, weights resident across tiles
    tb = _round_up(min(batch_tile, _round_up(B, 8)), 8)
    B_pad = _round_up(B, tb)
    if B_pad != B:
        x_in = jnp.pad(x_in, ((0, B_pad - B), (0, 0)))
    grid = (B_pad // tb,)

    # TODO(synk): for very large fused weight stacks (> ~40 MiB) on v7x
    # (64 MiB VMEM), chunk the model axis and/or set vmem_limit_bytes.
    out = pl.pallas_call(
        _fused_linear_relu_kernel,
        out_shape=jax.ShapeDtypeStruct((B_pad, N), out_dtype),
        grid_spec=pltpu.PrefetchScalarGridSpec(
            num_scalar_prefetch=0,
            grid=grid,
            in_specs=[
                pl.BlockSpec((tb, C), lambda i: (i, 0)),   # batch tile of x
                pl.BlockSpec((C, N), lambda i: (0, 0)),    # fused weight (resident)
                pl.BlockSpec((1, N), lambda i: (0, 0)),    # fused bias (resident)
            ],
            out_specs=pl.BlockSpec((tb, N), lambda i: (i, 0)),  # direct concat layout
        ),
        compiler_params=pltpu.CompilerParams(
            dimension_semantics=("parallel",)),
    )(x_in, w_in, b_cat)

    if B_pad != B:
        out = out[:B]
    # Output is already torch.cat(dim=-1) + flatten: (B, M*h).
    # TODO(synk): conv_dropout=True path not implemented (module default False).
    return out


def _reference_forward(x, weights, biases):
    """Plain-JAX reference with identical semantics (for validation)."""
    M, c, h = weights.shape
    if x.ndim > 2:
        p = x.shape[-1]
        x = x[:, 0, :, p // 2, p // 2]
    outs = []
    off = 0
    for m in range(M):
        z = jnp.maximum(x[:, off:off + c] @ weights[m] + biases[m], 0.0)
        outs.append(z)
        off += c
    out = jnp.concatenate(outs, axis=-1)
    return out.reshape(out.shape[0], -1)


if __name__ == "__main__":
    # Small shapes: batch=2, M=3 spectral-domain sub-models, 4 channels each
    # (total 12 spectral channels), hidden=32 per sub-model, 5x5 patch.
    B, M, c, h, P = 2, 3, 4, 32, 5
    C = M * c

    key = jax.random.PRNGKey(0)
    kx, kw, kb = jax.random.split(key, 3)

    x = jax.random.normal(kx, (B, 1, C, P, P), dtype=jnp.float32)
    weights = 0.1 * jax.random.normal(kw, (M, c, h), dtype=jnp.float32)
    biases = 0.1 * jax.random.normal(kb, (M, h), dtype=jnp.float32)

    ref = jax.block_until_ready(_reference_forward(x, weights, biases))

    # f32 path: strict check.
    out = jax.block_until_ready(hyperspectral_wrapper_forward(x, weights, biases))
    assert out.shape == (B, M * h), out.shape
    assert jnp.allclose(out, ref, atol=1e-5, rtol=1e-5), "f32 mismatch vs reference"

    # bf16 compute path (v6e/v7x weight-streaming optimization): loose check.
    out_bf16 = jax.block_until_ready(
        hyperspectral_wrapper_forward(x, weights, biases,
                                      compute_dtype=jnp.bfloat16))
    assert out_bf16.shape == (B, M * h), out_bf16.shape
    assert jnp.allclose(out_bf16, ref, atol=5e-2, rtol=5e-2), "bf16 mismatch vs reference"

    print("KERNEL_OK")
</pallas_src>

<mosaic_0001>
module attributes {stable_mosaic.version = 11 : i64} {
  func.func @_fused_linear_relu_kernel(%arg0: i32, %arg1: memref<8x12xf32, #tpu.memory_space<vmem>>, %arg2: memref<12x96xf32, #tpu.memory_space<vmem>>, %arg3: memref<1x96xf32, #tpu.memory_space<vmem>>, %arg4: memref<8x96xf32, #tpu.memory_space<vmem>>) attributes {dimension_semantics = [#tpu.dimension_semantics<parallel>], iteration_bounds = array<i64: 1>, scalar_prefetch = 0 : i64, scratch_operands = 0 : i64, tpu.core_type = #tpu.core_type<tc>, window_params = [{transform_indices = @transform_0, window_bounds = array<i64: 8, 12>}, {pipeline_mode = #tpu.pipeline_mode<synchronous>, transform_indices = @transform_1, window_bounds = array<i64: 12, 96>}, {pipeline_mode = #tpu.pipeline_mode<synchronous>, transform_indices = @transform_2, window_bounds = array<i64: 1, 96>}, {transform_indices = @transform_3, window_bounds = array<i64: 8, 96>}]} {
    %c0 = arith.constant 0 : index
    %c0_0 = arith.constant 0 : index
    %0 = vector.load %arg1[%c0, %c0_0] : memref<8x12xf32, #tpu.memory_space<vmem>>, vector<8x12xf32>
    %c0_1 = arith.constant 0 : index
    %c0_2 = arith.constant 0 : index
    %1 = vector.load %arg2[%c0_1, %c0_2] : memref<12x96xf32, #tpu.memory_space<vmem>>, vector<12x96xf32>
    %cst = arith.constant dense<0.000000e+00> : vector<8x96xf32>
    %2 = tpu.matmul %0, %1, %cst {dimension_numbers = #tpu.dot_dimension_numbers<[1], [0], [0], [1], [0, 0, 1, 1], [], []>} : vector<8x12xf32>, vector<12x96xf32>, vector<8x96xf32> -> vector<8x96xf32>
    %c0_3 = arith.constant 0 : index
    %c0_4 = arith.constant 0 : index
    %3 = vector.load %arg3[%c0_3, %c0_4] : memref<1x96xf32, #tpu.memory_space<vmem>>, vector<1x96xf32>
    %4 = vector.broadcast %3 : vector<1x96xf32> to vector<8x96xf32>
    %5 = arith.addf %2, %4 : vector<8x96xf32>
    %cst_5 = arith.constant 0.000000e+00 : f32
    %6 = vector.broadcast %cst_5 : f32 to vector<8x96xf32>
    %7 = arith.maximumf %5, %6 : vector<8x96xf32>
    %c0_6 = arith.constant 0 : index
    %c0_7 = arith.constant 0 : index
    %8 = vector.load %arg4[%c0_6, %c0_7] : memref<8x96xf32, #tpu.memory_space<vmem>>, vector<8x96xf32>
    tpu.vector_store %arg4[%c0_6, %c0_7], %7 {strides = array<i32>} : memref<8x96xf32, #tpu.memory_space<vmem>>, vector<8x96xf32>,
    return
  }
  func.func @transform_0(%arg0: i32) -> (i32, i32) {
    %c0_i32 = arith.constant 0 : i32
    %c0_i32_0 = arith.constant 0 : i32
    return %arg0, %c0_i32 : i32, i32
  }
  func.func @transform_1(%arg0: i32) -> (i32, i32) {
    %c0_i32 = arith.constant 0 : i32
    %c0_i32_0 = arith.constant 0 : i32
    %c0_i32_1 = arith.constant 0 : i32
    return %c0_i32, %c0_i32_0 : i32, i32
  }
  func.func @transform_2(%arg0: i32) -> (i32, i32) {
    %c0_i32 = arith.constant 0 : i32
    %c0_i32_0 = arith.constant 0 : i32
    %c0_i32_1 = arith.constant 0 : i32
    return %c0_i32, %c0_i32_0 : i32, i32
  }
  func.func @transform_3(%arg0: i32) -> (i32, i32) {
    %c0_i32 = arith.constant 0 : i32
    %c0_i32_0 = arith.constant 0 : i32
    return %arg0, %c0_i32 : i32, i32
  }
}

</mosaic_0001>

<bundles_post_ra>
// kernel: tpu_custom_call.1
= control target key start
LH: loop header
LB: loop body
LE: loop exit
PB: predicated region body
PF: predicated region fallthrough
CT: control target
= control target key end

     0   :  { %8 = vsyncpa [#allocation3], 0  ;;  %s321_s0 = inlined_call_operand.hbm [shape: f32[8,12], index: 0, kind: input, shape index: {}]   ;;  %s322_s1 = inlined_call_operand.hbm [shape: f32[12,96], index: 1, kind: input, shape index: {}]   ;;  %s323_s2 = inlined_call_operand.vmem [shape: f32[1,96], index: 2, kind: input, shape index: {}]   ;;  %s324_s3 = inlined_call_operand.hbm [shape: f32[8,96], index: 3, kind: output, shape index: {}]  }
   0x1   :  { %9 = vsyncpa [#allocation6], 0 }
   0x2   :  { %10 = vsyncpa [#allocation4], 0  ;;  %s246_s12 = smov [#allocation2]   ;;  %s247_s14 = smov [#allocation5]  }
   0x3   :  { %s17_s13 = sshll.u32 %s246_s12, 4  ;;  %s26_s15 = sshll.u32 %s247_s14, 4  ;;  %s18_s13 = int_to_ptr.vmem [resolvable:$true] %s17_s13  ;;  %s275_s15 = int_to_ptr.vmem [resolvable:$true] %s26_s15 }
   0x4   :  { %s174_s18 = scalar_lea.hbm %s321_s0, 128 }
   0x5   :  { %p175_p0 = scmp.ne.s32.totalorder %s321_s0, %s174_s18  ;;  %p178_p1 = scmp.lt.u32.totalorder %s174_s18, %s321_s0 }
   0x7   :  { %p180_p2 = pnand %p178_p1, %p175_p0 }
   0x9   :  { %183 = shalt.err (!%p180_p2)
}
   0xa   :  { %s184_s23 = scalar_lea.vmem %s18_s13, 128  ;;  %p189_p4 = scmp.lt.s32.totalorder %s18_s13, %s18_s13 }
   0xb   :  { %p185_p3 = scmp.ne.s32.totalorder %s18_s13, %s184_s23  ;;  %p190_p5 = scmp.lt.s32.totalorder %s184_s23, %s184_s23 }
   0xd   :  { %p191_p6 = por %p190_p5, %p189_p4 }
   0xf   :  { %p192_p7 = pnand %p191_p6, %p185_p3 }
  0x11   :  { %195 = shalt.err (!%p192_p7)
}
  0x12   :  { %20 = dma.hbm_to_vmem [thread:$0]  %s321_s0, 128, %s18_s13, [#allocation3]  }
  0x13   :  { %s196_s28 = scalar_lea.hbm %s322_s1, 256 }
  0x14   :  { %p197_p8 = scmp.ne.s32.totalorder %s322_s1, %s196_s28  ;;  %p200_p9 = scmp.lt.u32.totalorder %s196_s28, %s322_s1 }
  0x16   :  { %p202_p10 = pnand %p200_p9, %p197_p8 }
  0x18   :  { %205 = shalt.err (!%p202_p10)
}
  0x19   :  { %s206_s6 = scalar_lea.vmem %s275_s15, 256  ;;  %p211_p12 = scmp.lt.s32.totalorder %s275_s15, %s275_s15 }
  0x1a   :  { %p207_p11 = scmp.ne.s32.totalorder %s275_s15, %s206_s6  ;;  %p212_p13 = scmp.lt.s32.totalorder %s206_s6, %s206_s6 }
  0x1c   :  { %p213_p0 = por %p212_p13, %p211_p12 }
  0x1e   :  { %p214_p1 = pnand %p213_p0, %p207_p11 }
  0x20   :  { %217 = shalt.err (!%p214_p1)
}
  0x21   :  { %s248_s0 = smov 128   ;;  %s249_s7 = smov 8  }
  0x22   :  { %32 = dma.hbm_to_vmem [thread:$0]  %s322_s1, 256, %s275_s15, [#allocation6], %s248_s0, %s248_s0, %s249_s7  }
  0x23   :  { %240 = dma.done.wait [#allocation3], 128  }
  0x24   :  { %241 = vsyncadd [#allocation3], 4294967168 }
  0x25   :  { %242 = dma.done.wait [#allocation6], 256  }
  0x26   :  { %243 = vsyncadd [#allocation6], 4294967040  ;;  %v250_v0 = vmov 0.0|0.0   ;;  %vm251_vm0 = vmmov 0   ;;  %v252_v1 = vmov 0.0   ;;  %vm55_vm1 = vcmask 1043456  }
  0x27   :  { %161 = vmatprep.subr.bf16.mxu0 %v250_v0  ;;  %158 = vmatprep.mubr.msk.f32.mxu0 %vm251_vm0, %v252_v1  ;;  %v42_v2 = vld [vmem:[#allocation5] sm:$0xff]  ;;  %v43_v3 = vld [vmem:[#allocation5 + $0x8] sm:$0xf]  ;;  %vm253_vm2 = vmmov 1   ;;  %v41_v5 = vld [vmem:[#allocation2] sm:$0xff]  ;;  %vm51_vm4 = vcmask 97280  }
  0x28   :  { %vm163_vm3 = vmpackc.low %vm55_vm1, %vm253_vm2  ;;  %v162_v4 = vpack.c.bf16 %v43_v3, %v42_v2  ;;  %v148_v6 = vld [vmem:[%s323_s2] ss:$0 sm:$0xff]  ;;  %s254_s11 = smov [#allocation7]   ;;  %vm130_vm5 = vcmask 785408  }
  0x29   :  { %s138_s12 = sshll.u32 %s254_s11, 4  ;;  %s139_s12 = int_to_ptr.vmem [resolvable:$true] %s138_s12 }
  0x2a   :  { %164 = vmatpush3.bf16.msk.msra.mxu0 %vm163_vm3, %v162_v4  ;;  %s218_s13 = scalar_lea.vmem %s139_s12, 128  ;;  %p223_p3 = scmp.lt.s32.totalorder %s139_s12, %s139_s12 }
  0x2b   :  { %p219_p2 = scmp.ne.s32.totalorder %s139_s12, %s218_s13  ;;  %p224_p4 = scmp.lt.s32.totalorder %s218_s13, %s218_s13 }
  0x2d   :  { %159 = vmatmul.mubr.msk.f32.vlgmr.msra.gmra.mrb[0].mxu0 %vm51_vm4, %v41_v5  ;;  %p225_p5 = por %p224_p4, %p223_p3 }
  0x2f   :  { %p226_p6 = pnand %p225_p5, %p219_p2 }
 0x100   :  { %v125_v7 = vpop.f32.mrb[0].mxu0 }
 0x101   :  { %v126_v8 = vadd.f32 %v148_v6, %v125_v7  ;;  %v160_v9 = vpop.f32.mrb[1].mxu0 }
 0x103   :  { %v129_v10 = vmax.f32 %v126_v8, 0.0 }
 0x105   :  { %131 = vst.msk [vmem:[#allocation7] sm:$0xff] %vm130_vm5, %v129_v10 }
 0x106   :  { %229 = shalt.err (!%p226_p6)
}
 0x107   :  { %s230_s2 = scalar_lea.hbm %s324_s3, 128 }
 0x108   :  { %p231_p7 = scmp.ne.s32.totalorder %s324_s3, %s230_s2  ;;  %p234_p8 = scmp.lt.u32.totalorder %s230_s2, %s324_s3 }
 0x10a   :  { %p236_p9 = pnand %p234_p8, %p231_p7 }
 0x10c   :  { %239 = shalt.err (!%p236_p9)
}
 0x10d   :  { %141 = dma.vmem_to_hbm [thread:$0]  %s139_s12, 128, %s324_s3, [#allocation4]  }
 0x10e   :  { %244 = dma.done.wait [#allocation4], 128  }
 0x10f   :  { %245 = vsyncadd [#allocation4], 4294967168 }
 0x110   :  { %145 = vsyncpa [#allocation3], 1 }
 0x111   :  { %146 = vsyncpa [#allocation6], 1 }
 0x112   :  { %147 = vsyncpa [#allocation4], 1 }

</bundles_post_ra>
